<compile_context>
chip_gen: v6e
topology: v6e:2x2x1
jax: 0.10.0
libtpu: 0.0.40
codegen_flags: <defaults>
</compile_context>

<pallas_src>
import functools

import jax
import jax.numpy as jnp
from jax.experimental import pallas as pl
from jax.experimental.pallas import tpu as pltpu

LANE = 128  # TPU lane width


def _round_up(x, m):
    return ((x + m - 1) // m) * m


def encoder_kernel(x_ref, w1_ref, b1_ref, w2_ref, b2_ref, w3_ref, b3_ref, o_ref):
    # Layer 1: Linear + ReLU   (bf16 operands, f32 accumulate)
    h = jnp.dot(x_ref[...], w1_ref[...], preferred_element_type=jnp.float32)
    h = jnp.maximum(h + b1_ref[...], 0.0)
    # Layer 2: Linear + ReLU
    h = jnp.dot(h.astype(jnp.bfloat16), w2_ref[...], preferred_element_type=jnp.float32)
    h = jnp.maximum(h + b2_ref[...], 0.0)
    # Layer 3: Linear + Sigmoid (sigmoid lowers to exp/recip on the EUP)
    h = jnp.dot(h.astype(jnp.bfloat16), w3_ref[...], preferred_element_type=jnp.float32)
    o_ref[...] = jax.nn.sigmoid(h + b3_ref[...]).astype(o_ref.dtype)


def prepare_params(params, lane=LANE):
    """Zero-pad feature dims up to the lane width and cast weights to bf16.

    Padding is mathematically a no-op: padded bias entries are 0, ReLU(0) = 0,
    padded weight rows are 0, so padded lanes never contribute to real outputs.
    """
    prepared = []
    for w, b in params:
        fi, fo = w.shape
        fi_p, fo_p = _round_up(fi, lane), _round_up(fo, lane)
        w_p = jnp.zeros((fi_p, fo_p), jnp.bfloat16).at[:fi, :fo].set(w.astype(jnp.bfloat16))
        b_p = jnp.zeros((1, fo_p), jnp.float32).at[:, :fo].set(b.astype(jnp.float32))
        prepared.append((w_p, b_p))
    return tuple(prepared)


@functools.partial(jax.jit, static_argnames=("out_features", "tile_b", "out_dtype"))
def encoder_forward(x, padded_params, *, out_features, tile_b=256, out_dtype=jnp.float32):
    """Fused encoder MLP.  x: [B, latent] f32; padded_params from prepare_params()."""
    (w1, b1), (w2, b2), (w3, b3) = padded_params
    B = x.shape[0]
    in_dim = w1.shape[0]          # padded input feature width
    out_dim_p = w3.shape[1]       # padded output feature width (== 256 here)

    # Pad batch up to a whole number of tiles and features up to `in_dim`;
    # cast the input to bf16 (halves the input DMA stream).
    num_tiles = pl.cdiv(B, tile_b)
    b_pad = num_tiles * tile_b
    x = jnp.pad(x.astype(jnp.bfloat16), ((0, b_pad - B), (0, in_dim - x.shape[1])))

    # Advisory cost for XLA's scheduler.
    flops = 2 * b_pad * (w1.shape[0] * w1.shape[1]
                         + w2.shape[0] * w2.shape[1]
                         + w3.shape[0] * w3.shape[1])
    bytes_accessed = (
        x.size * 2
        + sum(w.size * 2 + b.size * 4 for (w, b) in ((w1, b1), (w2, b2), (w3, b3)))
        + b_pad * out_dim_p * jnp.dtype(out_dtype).itemsize
    )
    cost = pl.CostEstimate(flops=flops,
                           transcendentals=b_pad * out_dim_p,
                           bytes_accessed=bytes_accessed)

    resident = lambda shape: pl.BlockSpec(shape, lambda i: (0, 0))  # same block every step

    out = pl.pallas_call(
        encoder_kernel,
        out_shape=jax.ShapeDtypeStruct((b_pad, out_dim_p), out_dtype),
        grid=(num_tiles,),
        in_specs=[
            pl.BlockSpec((tile_b, in_dim), lambda i: (i, 0)),   # x: tiled over batch
            resident(w1.shape), resident(b1.shape),             # weights/biases: VMEM-resident
            resident(w2.shape), resident(b2.shape),
            resident(w3.shape), resident(b3.shape),
        ],
        out_specs=pl.BlockSpec((tile_b, out_dim_p), lambda i: (i, 0)),
        compiler_params=pltpu.CompilerParams(
            dimension_semantics=("parallel",),   # batch tiles are independent -> both TCs on v7x
            vmem_limit_bytes=64 * 1024 * 1024,
        ),
        cost_estimate=cost,
    )(x, w1, b1, w2, b2, w3, b3)

    # Drop batch padding and any padded output lanes.
    return out[:B, :out_features]


def init_linear(key, fan_in, fan_out):
    """Deterministic init mimicking torch.nn.Linear default (uniform +/- 1/sqrt(fan_in))."""
    kw, kb = jax.random.split(key)
    bound = 1.0 / jnp.sqrt(fan_in)
    w = jax.random.uniform(kw, (fan_in, fan_out), jnp.float32, -bound, bound)
    b = jax.random.uniform(kb, (1, fan_out), jnp.float32, -bound, bound)
    return w, b


def reference_forward(x, params):
    """Pure-JAX reference with the same bf16 rounding of matmul operands."""
    (w1, b1), (w2, b2), (w3, b3) = params
    bf = lambda a: a.astype(jnp.bfloat16).astype(jnp.float32)
    h = jnp.maximum(bf(x) @ bf(w1) + b1, 0.0)
    h = jnp.maximum(bf(h) @ bf(w2) + b2, 0.0)
    return jax.nn.sigmoid(bf(h) @ bf(w3) + b3)


if __name__ == "__main__":
    key = jax.random.PRNGKey(0)
    k_x, k1, k2, k3 = jax.random.split(key, 4)

    batch, latent, h1, h2, out = 384, 32, 64, 128, 256

    x = jax.random.normal(k_x, (batch, latent), jnp.float32)
    params = (
        init_linear(k1, latent, h1),
        init_linear(k2, h1, h2),
        init_linear(k3, h2, out),
    )
    padded_params = prepare_params(params)

    # tile_b=128 here so the small example still exercises a multi-step grid
    # (384 rows -> 3 pipelined tiles); production default is 256.
    y = encoder_forward(x, padded_params, out_features=out, tile_b=128)
    y = jax.block_until_ready(y)

    y_ref = reference_forward(x, params)
    assert y.shape == (batch, out)
    err = float(jnp.max(jnp.abs(y - y_ref)))
    assert jnp.allclose(y, y_ref, atol=2e-3, rtol=2e-3), err

    print("KERNEL_OK")
</pallas_src>

<mosaic_0001>
module attributes {stable_mosaic.version = 11 : i64} {
  func.func @encoder_kernel(%arg0: i32, %arg1: memref<128x128xbf16, #tpu.memory_space<vmem>>, %arg2: memref<128x128xbf16, #tpu.memory_space<vmem>>, %arg3: memref<1x128xf32, #tpu.memory_space<vmem>>, %arg4: memref<128x128xbf16, #tpu.memory_space<vmem>>, %arg5: memref<1x128xf32, #tpu.memory_space<vmem>>, %arg6: memref<128x256xbf16, #tpu.memory_space<vmem>>, %arg7: memref<1x256xf32, #tpu.memory_space<vmem>>, %arg8: memref<128x256xf32, #tpu.memory_space<vmem>>) attributes {dimension_semantics = [#tpu.dimension_semantics<parallel>], iteration_bounds = array<i64: 3>, scalar_prefetch = 0 : i64, scratch_operands = 0 : i64, tpu.core_type = #tpu.core_type<tc>, window_params = [{transform_indices = @transform_0, window_bounds = array<i64: 128, 128>}, {pipeline_mode = #tpu.pipeline_mode<synchronous>, transform_indices = @transform_1, window_bounds = array<i64: 128, 128>}, {pipeline_mode = #tpu.pipeline_mode<synchronous>, transform_indices = @transform_2, window_bounds = array<i64: 1, 128>}, {pipeline_mode = #tpu.pipeline_mode<synchronous>, transform_indices = @transform_3, window_bounds = array<i64: 128, 128>}, {pipeline_mode = #tpu.pipeline_mode<synchronous>, transform_indices = @transform_4, window_bounds = array<i64: 1, 128>}, {pipeline_mode = #tpu.pipeline_mode<synchronous>, transform_indices = @transform_5, window_bounds = array<i64: 128, 256>}, {pipeline_mode = #tpu.pipeline_mode<synchronous>, transform_indices = @transform_6, window_bounds = array<i64: 1, 256>}, {transform_indices = @transform_7, window_bounds = array<i64: 128, 256>}]} {
    %c0 = arith.constant 0 : index
    %c0_0 = arith.constant 0 : index
    %0 = vector.load %arg1[%c0, %c0_0] : memref<128x128xbf16, #tpu.memory_space<vmem>>, vector<128x128xbf16>
    %c0_1 = arith.constant 0 : index
    %c0_2 = arith.constant 0 : index
    %1 = vector.load %arg2[%c0_1, %c0_2] : memref<128x128xbf16, #tpu.memory_space<vmem>>, vector<128x128xbf16>
    %cst = arith.constant dense<0.000000e+00> : vector<128x128xf32>
    %2 = tpu.matmul %0, %1, %cst {dimension_numbers = #tpu.dot_dimension_numbers<[1], [0], [0], [1], [0, 0, 1, 1], [], []>} : vector<128x128xbf16>, vector<128x128xbf16>, vector<128x128xf32> -> vector<128x128xf32>
    %c0_3 = arith.constant 0 : index
    %c0_4 = arith.constant 0 : index
    %3 = vector.load %arg3[%c0_3, %c0_4] : memref<1x128xf32, #tpu.memory_space<vmem>>, vector<1x128xf32>
    %4 = vector.broadcast %3 : vector<1x128xf32> to vector<128x128xf32>
    %5 = arith.addf %2, %4 : vector<128x128xf32>
    %cst_5 = arith.constant 0.000000e+00 : f32
    %6 = vector.broadcast %cst_5 : f32 to vector<128x128xf32>
    %7 = arith.maximumf %5, %6 : vector<128x128xf32>
    %8 = arith.truncf %7 : vector<128x128xf32> to vector<128x128xbf16>
    %c0_6 = arith.constant 0 : index
    %c0_7 = arith.constant 0 : index
    %9 = vector.load %arg4[%c0_6, %c0_7] : memref<128x128xbf16, #tpu.memory_space<vmem>>, vector<128x128xbf16>
    %cst_8 = arith.constant dense<0.000000e+00> : vector<128x128xf32>
    %10 = tpu.matmul %8, %9, %cst_8 {dimension_numbers = #tpu.dot_dimension_numbers<[1], [0], [0], [1], [0, 0, 1, 1], [], []>} : vector<128x128xbf16>, vector<128x128xbf16>, vector<128x128xf32> -> vector<128x128xf32>
    %c0_9 = arith.constant 0 : index
    %c0_10 = arith.constant 0 : index
    %11 = vector.load %arg5[%c0_9, %c0_10] : memref<1x128xf32, #tpu.memory_space<vmem>>, vector<1x128xf32>
    %12 = vector.broadcast %11 : vector<1x128xf32> to vector<128x128xf32>
    %13 = arith.addf %10, %12 : vector<128x128xf32>
    %cst_11 = arith.constant 0.000000e+00 : f32
    %14 = vector.broadcast %cst_11 : f32 to vector<128x128xf32>
    %15 = arith.maximumf %13, %14 : vector<128x128xf32>
    %16 = arith.truncf %15 : vector<128x128xf32> to vector<128x128xbf16>
    %c0_12 = arith.constant 0 : index
    %c0_13 = arith.constant 0 : index
    %17 = vector.load %arg6[%c0_12, %c0_13] : memref<128x256xbf16, #tpu.memory_space<vmem>>, vector<128x256xbf16>
    %cst_14 = arith.constant dense<0.000000e+00> : vector<128x256xf32>
    %18 = tpu.matmul %16, %17, %cst_14 {dimension_numbers = #tpu.dot_dimension_numbers<[1], [0], [0], [1], [0, 0, 1, 1], [], []>} : vector<128x128xbf16>, vector<128x256xbf16>, vector<128x256xf32> -> vector<128x256xf32>
    %c0_15 = arith.constant 0 : index
    %c0_16 = arith.constant 0 : index
    %19 = vector.load %arg7[%c0_15, %c0_16] : memref<1x256xf32, #tpu.memory_space<vmem>>, vector<1x256xf32>
    %20 = vector.broadcast %19 : vector<1x256xf32> to vector<128x256xf32>
    %21 = arith.addf %18, %20 : vector<128x256xf32>
    %22 = arith.negf %21 : vector<128x256xf32>
    %23 = math.exp %22 : vector<128x256xf32>
    %cst_17 = arith.constant 1.000000e+00 : f32
    %24 = vector.broadcast %cst_17 : f32 to vector<128x256xf32>
    %25 = arith.addf %24, %23 : vector<128x256xf32>
    %26 = arith.divf %24, %25 : vector<128x256xf32>
    %c0_18 = arith.constant 0 : index
    %c0_19 = arith.constant 0 : index
    %27 = vector.load %arg8[%c0_18, %c0_19] : memref<128x256xf32, #tpu.memory_space<vmem>>, vector<128x256xf32>
    tpu.vector_store %arg8[%c0_18, %c0_19], %26 {strides = array<i32>} : memref<128x256xf32, #tpu.memory_space<vmem>>, vector<128x256xf32>,
    return
  }
  func.func @transform_0(%arg0: i32) -> (i32, i32) {
    %c0_i32 = arith.constant 0 : i32
    %c0_i32_0 = arith.constant 0 : i32
    return %arg0, %c0_i32 : i32, i32
  }
  func.func @transform_1(%arg0: i32) -> (i32, i32) {
    %c0_i32 = arith.constant 0 : i32
    %c0_i32_0 = arith.constant 0 : i32
    %c0_i32_1 = arith.constant 0 : i32
    return %c0_i32, %c0_i32_0 : i32, i32
  }
  func.func @transform_2(%arg0: i32) -> (i32, i32) {
    %c0_i32 = arith.constant 0 : i32
    %c0_i32_0 = arith.constant 0 : i32
    %c0_i32_1 = arith.constant 0 : i32
    return %c0_i32, %c0_i32_0 : i32, i32
  }
  func.func @transform_3(%arg0: i32) -> (i32, i32) {
    %c0_i32 = arith.constant 0 : i32
    %c0_i32_0 = arith.constant 0 : i32
    %c0_i32_1 = arith.constant 0 : i32
    return %c0_i32, %c0_i32_0 : i32, i32
  }
  func.func @transform_4(%arg0: i32) -> (i32, i32) {
    %c0_i32 = arith.constant 0 : i32
    %c0_i32_0 = arith.constant 0 : i32
    %c0_i32_1 = arith.constant 0 : i32
    return %c0_i32, %c0_i32_0 : i32, i32
  }
  func.func @transform_5(%arg0: i32) -> (i32, i32) {
    %c0_i32 = arith.constant 0 : i32
    %c0_i32_0 = arith.constant 0 : i32
    %c0_i32_1 = arith.constant 0 : i32
    return %c0_i32, %c0_i32_0 : i32, i32
  }
  func.func @transform_6(%arg0: i32) -> (i32, i32) {
    %c0_i32 = arith.constant 0 : i32
    %c0_i32_0 = arith.constant 0 : i32
    %c0_i32_1 = arith.constant 0 : i32
    return %c0_i32, %c0_i32_0 : i32, i32
  }
  func.func @transform_7(%arg0: i32) -> (i32, i32) {
    %c0_i32 = arith.constant 0 : i32
    %c0_i32_0 = arith.constant 0 : i32
    return %arg0, %c0_i32 : i32, i32
  }
}

</mosaic_0001>

<bundles_post_ra>
// kernel: encoder_forward.1
= control target key start
LH: loop header
LB: loop body
LE: loop exit
PB: predicated region body
PF: predicated region fallthrough
CT: control target
= control target key end

     0   :  { %12 = vsyncpa [#allocation3], 0  ;;  %s2059_s0 = inlined_call_operand.vmem [shape: bf16[384,128], index: 0, kind: input, shape index: {}]   ;;  %s2060_s1 = inlined_call_operand.vmem [shape: bf16[128,128], index: 1, kind: input, shape index: {}]   ;;  %s2061_s2 = inlined_call_operand.vmem [shape: f32[1,128], index: 2, kind: input, shape index: {}]   ;;  %s2062_s3 = inlined_call_operand.vmem [shape: bf16[128,128], index: 3, kind: input, shape index: {}]   ;;  %s2063_s4 = inlined_call_operand.vmem [shape: f32[1,128], index: 4, kind: input, shape index: {}]   ;;  %s2064_s5 = inlined_call_operand.vmem [shape: bf16[128,256], index: 5, kind: input, shape index: {}]   ;;  %s2065_s6 = inlined_call_operand.vmem [shape: f32[1,256], index: 6, kind: input, shape index: {}]   ;;  %s2066_s7 = inlined_call_operand.hbm [shape: f32[384,256], index: 7, kind: output, shape index: {}]  }
   0x1   :  { %14 = vsyncpa [#allocation3 + $0x1], 0  ;;  %s1760_s24 = smov 0   ;;  %s1762_s25 = smov 0  }
   0x2   :  { %s1764_s26 = smov 0   ;;  %s1766_s27 = smov 0  }
   0x3 LB: > { %s1781_s28 = sadd.s32 4294967295, %s1714_s27   ;;  %s1251_s29 = sadd.s32 4294967294, %s1714_s27   ;;  %s1714_s27 = sphi %s1766_s27, %s2072_s27   ;;  %s1710_s26 = sphi %s1764_s26, %s2071_s26   ;;  %s1706_s25 = sphi %s1762_s25, %s2070_s25   ;;  %s1702_s24 = sphi %s1760_s24, %s2069_s24  }
   0x4   : > { %s1785_s30 = sadd.s32 1, %s1714_s27   ;;  %s179_s8 = sadd.s32 1, %s1710_s26 }
   0x5   : > { %s176_s9 = ssub.s32 %s1714_s27, %s1785_s30  ;;  %p189_p0 = scmp.ne.s32.totalorder %s1710_s26, %s1706_s25 }
   0x6   : > { %p177_p1 = scmp.eq.s32.totalorder %s176_s9, 0  ;;  %p190_p2 = scmp.eq.s32.totalorder %s1781_s28, 2 }
   0x7   : > { %p195_p3 = scmp.ne.s32.totalorder %s1706_s25, %s1702_s24  ;;  %p196_p4 = scmp.eq.s32.totalorder %s1251_s29, 2 }
   0x8   : > { %s1796_s10 = scalar_select %p177_p1, %s1710_s26, %s179_s8  }
   0x9   : > { %p1798_p5 = por %p190_p2, %p189_p0  ;;  %p1802_p6 = por %p196_p4, %p195_p3 }
   0xa   : > { %p1254_p7 = scmp.ge.s32.totalorder %s1714_s27, 1  ;;  %p241_p8 = scmp.lt.s32.totalorder %s1714_s27, 4 }
   0xc   : > { %p242_p9 = pnand %p1254_p7, %p241_p8 }
   0xd   : > { %s1256_s15 = sshll.u32 (!%p242_p9), %s1781_s28, 4  ;;  %s270_s19 = sand.u32 (!%p242_p9), 1, %s1706_s25  }
   0xe   : > { %245 = sbr.rel (%p242_p9) target bundleno = 767 (0x2ff), region = 48  ;;  %p274_p10 = scmp.lt.s32.totalorder (!%p242_p9), %s1256_s15, 47 }
   0xf   : > { %s1339_s22 = sshll.u32 (!%p242_p9), %s1781_s28, 12  ;;  %s2019_s13 = scalar_lea.sflag (!%p242_p9), [#allocation3], %s270_s19 }
  0x10   : > { %s2011_s9 = scalar_lea.hbm (!%p242_p9), %s2066_s7, %s1339_s22  ;;  %s1717_s14 = smov (!%p242_p9), [#allocation2]  }
  0x13   : > { %v1478_v0 = vld [vmem:[%s2060_s1 + $0x38] sm:$0xff]   ;;  %v1479_v1 = vld [vmem:[%s2060_s1 + $0x30] sm:$0xff]   ;;  %s2074_s15 = smov (!%p274_p10, %s1256_s15), 47  ;;  %v1480_v2 = vld [vmem:[%s2060_s1 + $0x28] sm:$0xff]  }
  0x14   : > { %1372 = vmatprep.subr.bf16.mxu1 %v1478_v0  ;;  %s1257_s20 = sshll.u32 %s2074_s15, 2  ;;  %v1481_v3 = vld [vmem:[%s2060_s1 + $0x20] sm:$0xff]   ;;  %v1482_v5 = vld [vmem:[%s2060_s1 + $0x18] sm:$0xff]   ;;  %v1483_v6 = vld [vmem:[%s2060_s1 + $0x10] sm:$0xff]   ;;  %s1658_s15 = sshll.u32 %s1717_s14, 4  ;;  %s1659_s15 = int_to_ptr.vmem [resolvable:$false] %s1658_s15 }
  0x15   : > { %1373 = vmatpush3.bf16.msra.mxu1 %v1478_v0  ;;  %s1821_s23 = scalar_lea.vmem %s2059_s0, %s1257_s20  ;;  %v1484_v7 = vld [vmem:[%s2060_s1 + $0x8] sm:$0xff]   ;;  %v1485_v8 = vld [vmem:[%s2060_s1] sm:$0xff]   ;;  %v1494_v9 = vld [vmem:[%s2062_s3 + $0x38] sm:$0xff]   ;;  %s1255_s20 = sshll.u32 %s270_s19, 8 }
  0x16   : > { %1374 = vmatprep.subr.bf16.mxu1 %v1479_v1  ;;  %v1486_v4 = vld [vmem:[%s1821_s23] sm:$0xff]   ;;  %v1487_v10 = vld [vmem:[%s1821_s23 + $0x8] sm:$0xff]   ;;  %v1488_v11 = vld [vmem:[%s1821_s23 + $0x10] sm:$0xff]   ;;  %s1959_s21 = scalar_lea.vmem [#allocation2], %s1255_s20  ;;  %s1660_s16 = scalar_lea.vmem %s1659_s15, 8192 }
  0x17   : > { %1388 = vmatprep.mubr.bf16.mxu1 %v1486_v4  ;;  %v1495_v12 = vld [vmem:[%s2062_s3 + $0x30] sm:$0xff]   ;;  %v1496_v13 = vld [vmem:[%s2062_s3 + $0x28] sm:$0xff]   ;;  %v1489_v14 = vld [vmem:[%s1821_s23 + $0x18] sm:$0xff]  }
  0x18   : > { %v1490_v15 = vld [vmem:[%s1821_s23 + $0x20] sm:$0xff]   ;;  %v1498_v17 = vld [vmem:[%s2062_s3 + $0x18] sm:$0xff]   ;;  %v1491_v18 = vld [vmem:[%s1821_s23 + $0x28] sm:$0xff]  }
  0x19   : > { %1375 = vmatpush3.bf16.msra.mxu1 %v1479_v1  ;;  %v1497_v16 = vld [vmem:[%s2062_s3 + $0x20] sm:$0xff]   ;;  %v1492_v19 = vld [vmem:[%s1821_s23 + $0x30] sm:$0xff]   ;;  %v1493_v20 = vld [vmem:[%s1821_s23 + $0x38] sm:$0xff]   ;;  %s1189_s23 = sshll.u32 %s1959_s21, 4  ;;  %s2013_s23 = int_to_ptr.vmem [resolvable:$true] %s1189_s23 }
  0x1a   : > { %1376 = vmatprep.subr.bf16.mxu1 %v1480_v2  ;;  %v1499_v21 = vld [vmem:[%s2062_s3 + $0x10] sm:$0xff]   ;;  %v1500_v22 = vld [vmem:[%s2062_s3 + $0x8] sm:$0xff]   ;;  %v1501_v23 = vld [vmem:[%s2062_s3] sm:$0xff]   ;;  %s1654_s28 = scalar_lea.vmem %s2013_s23, 4096  ;;  %p1661_p0 = scmp.lt.s32.totalorder %s2013_s23, %s1659_s15 }
  0x1b   : > { %v1502_v24 = vld [vmem:[%s2064_s5 + $0x74] ss:$8 sps:$4 sm:$0xff]   ;;  %v1504_v25 = vld [vmem:[%s2064_s5 + $0x70] ss:$8 sps:$4 sm:$0xff]   ;;  %v1505_v26 = vld [vmem:[%s2064_s5 + $0x64] ss:$8 sps:$4 sm:$0xff]   ;;  %p1655_p11 = scmp.ne.s32.totalorder %s2013_s23, %s1654_s28  ;;  %p1662_p1 = scmp.lt.s32.totalorder %s1660_s16, %s1654_s28 }
  0x1c   : > { %837 = vmatprep.subr.bf16.mxu0 %v1502_v24  ;;  %v1507_v27 = vld [vmem:[%s2064_s5 + $0x60] ss:$8 sps:$4 sm:$0xff]   ;;  %v1508_v28 = vld [vmem:[%s2064_s5 + $0x54] ss:$8 sps:$4 sm:$0xff]   ;;  %v1510_v29 = vld [vmem:[%s2064_s5 + $0x50] ss:$8 sps:$4 sm:$0xff]  }
  0x1d   : > { %1377 = vmatpush3.bf16.msra.mxu1 %v1480_v2  ;;  %838 = vmatpush1.bf16.msra.mxu0 %v1504_v25  ;;  %v1511_v30 = vld [vmem:[%s2064_s5 + $0x44] ss:$8 sps:$4 sm:$0xff]   ;;  %v1513_v31 = vld [vmem:[%s2064_s5 + $0x40] ss:$8 sps:$4 sm:$0xff]   ;;  %v1514_v32 = vld [vmem:[%s2064_s5 + $0x34] ss:$8 sps:$4 sm:$0xff]   ;;  %p1656_p12 = pnand %p1655_p11, %p1798_p5  ;;  %p1663_p2 = por %p1662_p1, %p1661_p0 }
  0x1e   : > { %1378 = vmatprep.subr.bf16.mxu1 %v1481_v3  ;;  %839 = vmatprep.subr.bf16.mxu0 %v1505_v26  ;;  %v1516_v33 = vld [vmem:[%s2064_s5 + $0x30] ss:$8 sps:$4 sm:$0xff]   ;;  %v1258_v36 = vld [vmem:[%s2061_s2] ss:$0 sm:$0xff] }
  0x1f   : > { %p1657_p13 = pneg %p1656_p12 }
  0x21   : > { %1379 = vmatpush3.bf16.msra.mxu1 %v1481_v3  ;;  %840 = vmatpush1.bf16.msra.mxu0 %v1507_v27  ;;  %v1517_v27 = vld [vmem:[%s2064_s5 + $0x24] ss:$8 sps:$4 sm:$0xff]   ;;  %p1664_p3 = pnand %p1663_p2, %p1657_p13 }
  0x22   : > { %1380 = vmatprep.subr.bf16.mxu1 %v1482_v5  ;;  %841 = vmatprep.subr.bf16.mxu0 %v1508_v28  ;;  %v1519_v28 = vld [vmem:[%s2064_s5 + $0x20] ss:$8 sps:$4 sm:$0xff]  }
  0x25   : > { %1381 = vmatpush3.bf16.msra.mxu1 %v1482_v5  ;;  %842 = vmatpush1.bf16.msra.mxu0 %v1510_v29  ;;  %v1520_v29 = vld [vmem:[%s2064_s5 + $0x14] ss:$8 sps:$4 sm:$0xff]  }
  0x26   : > { %1382 = vmatprep.subr.bf16.mxu1 %v1483_v6  ;;  %843 = vmatprep.subr.bf16.mxu0 %v1511_v30  ;;  %v1522_v30 = vld [vmem:[%s2064_s5 + $0x10] ss:$8 sps:$4 sm:$0xff]  }
  0x29   : > { %1383 = vmatpush3.bf16.msra.mxu1 %v1483_v6  ;;  %844 = vmatpush1.bf16.msra.mxu0 %v1513_v31  ;;  %v1523_v31 = vld [vmem:[%s2064_s5 + $0x4] ss:$8 sps:$4 sm:$0xff]  }
  0x2a   : > { %1384 = vmatprep.subr.bf16.mxu1 %v1484_v7  ;;  %845 = vmatprep.subr.bf16.mxu0 %v1514_v32  ;;  %v1525_v32 = vld [vmem:[%s2064_s5] ss:$8 sps:$4 sm:$0xff]  }
  0x2d   : > { %1385 = vmatpush3.bf16.msra.mxu1 %v1484_v7  ;;  %846 = vmatpush1.bf16.msra.mxu0 %v1516_v33  ;;  %v1716_v33 = vmov 0  }
  0x2e   : > { %1386 = vmatprep.subr.bf16.mxu1 %v1485_v8  ;;  %847 = vmatprep.subr.bf16.mxu0 %v1517_v27  ;;  %v747_v27 = vlaneseq }
  0x2f   : > { %869 = vmatprep.mubr.bf16.mxu0 %v1716_v33 }
  0x31   : > { %1387 = vmatpush3.bf16.msra.mxu1 %v1485_v8  ;;  %848 = vmatpush1.bf16.msra.mxu0 %v1519_v28  ;;  %v748_v28 = vshrl.u32 %v747_v27, 7 }
  0x32   : > { %1404 = vmatprep.subr.bf16.mxu1 %v1494_v9  ;;  %849 = vmatprep.subr.bf16.mxu0 %v1520_v29 }
  0x33   : > { %v749_v29 = vsub.s32 0, %v748_v28 }
  0x34   : > { %1389 = vmatmul.mubr.bf16.vlgmr.msra.gmra.mxu1 %v1487_v10 }
  0x35   : > { %1392 = vmatprep.mubr.bf16.mxu1 %v1488_v11  ;;  %1405 = vmatpush3.bf16.msra.mxu1 %v1494_v9 }
  0x36   : > { %1406 = vmatprep.subr.bf16.mxu1 %v1495_v12  ;;  %850 = vmatpush1.bf16.msra.mxu0 %v1522_v30  ;;  %v745_v30 = vld [vmem:[%s2065_s6] sm:$0x3] }
  0x37   : > { %851 = vmatprep.subr.bf16.mxu0 %v1523_v31  ;;  %v753_v31 = vsub.s32 1, %v748_v28 }
  0x39   : > { %1407 = vmatpush3.bf16.msra.mxu1 %v1495_v12 }
  0x3a   : > { %1408 = vmatprep.subr.bf16.mxu1 %v1496_v13  ;;  %852 = vmatpush1.bf16.msra.mxu0 %v1525_v32  ;;  %v1935_v32 = vrot.slane %v745_v30, %v749_v29 }
  0x3c   : > { %1393 = vmatmul.mubr.bf16.gmra.mxu1 %v1489_v14 }
  0x3d   : > { %1396 = vmatprep.mubr.bf16.mxu1 %v1490_v15  ;;  %1409 = vmatpush3.bf16.msra.mxu1 %v1496_v13 }
  0x3e   : > { %1410 = vmatprep.subr.bf16.mxu1 %v1497_v16 }
  0x41   : > { %1411 = vmatpush3.bf16.msra.mxu1 %v1497_v16 }
  0x42   : > { %1412 = vmatprep.subr.bf16.mxu1 %v1498_v17 }
  0x44   : > { %1397 = vmatmul.mubr.bf16.gmra.mxu1 %v1491_v18 }
  0x45   : > { %1400 = vmatprep.mubr.bf16.mxu1 %v1492_v19  ;;  %1413 = vmatpush3.bf16.msra.mxu1 %v1498_v17 }
  0x46   : > { %1414 = vmatprep.subr.bf16.mxu1 %v1499_v21 }
  0x49   : > { %1415 = vmatpush3.bf16.msra.mxu1 %v1499_v21 }
  0x4a   : > { %1416 = vmatprep.subr.bf16.mxu1 %v1500_v22 }
  0x4c   : > { %1401 = vmatmul.mubr.bf16.gmra.mxu1 %v1493_v20 }
  0x4d   : > { %1417 = vmatpush3.bf16.msra.mxu1 %v1500_v22 }
  0x4e   : > { %1418 = vmatprep.subr.bf16.mxu1 %v1501_v23 }
  0x51   : > { %1419 = vmatpush3.bf16.msra.mxu1 %v1501_v23 }
  0xf4   : > { %v1390_v34 = vpop.f32.mrf.mxu1 }
  0xf5   : > { %v459_v40 = vadd.f32 %v1390_v34, %v1258_v36 }
  0xf6   : > { %v450_v35 = vpop.f32.mrf.mxu1 }
  0xf7   : > { %v451_v38 = vadd.f32 %v1258_v36, %v450_v35  ;;  %v515_v47 = vmax.f32 %v459_v40, 0.0 }
  0xf8   : > { %v1391_v37 = vpop.f32.mrf.mxu1 }
  0xf9   : > { %v462_v39 = vadd.f32 %v1391_v37, %v1258_v36  ;;  %v513_v45 = vmax.f32 %v451_v38, 0.0 }
  0xfa   : > { %v453_v41 = vpop.f32.mrf.mxu1 }
  0xfb   : > { %v454_v42 = vadd.f32 %v1258_v36, %v453_v41  ;;  %v516_v43 = vmax.f32 %v462_v39, 0.0 }
  0xfc   : > { %v1394_v44 = vpop.f32.mrf.mxu1 }
  0xfd   : > { %v514_v46 = vmax.f32 %v454_v42, 0.0  ;;  %v475_v48 = vadd.f32 %v1394_v44, %v1258_v36  ;;  %v530_v52 = vpack.c.bf16 %v516_v43, %v515_v47 }
  0xfe   : > { %v466_v49 = vpop.f32.mrf.mxu1 }
  0xff   : > { %v529_v50 = vpack.c.bf16 %v514_v46, %v513_v45  ;;  %v467_v51 = vadd.f32 %v1258_v36, %v466_v49  ;;  %v519_v55 = vmax.f32 %v475_v48, 0.0 }
 0x100   : > { %v1395_v53 = vpop.f32.mrf.mxu1 }
 0x101   : > { %v478_v54 = vadd.f32 %v1395_v53, %v1258_v36  ;;  %1420 = vmatprep.mubr.bf16.mxu1 %v529_v50  ;;  %v517_v57 = vmax.f32 %v467_v51, 0.0 }
 0x102   : > { %v469_v56 = vpop.f32.mrf.mxu1  ;;  %1421 = vmatmul.mubr.bf16.vlgmr.msra.gmra.mxu1 %v530_v52 }
 0x103   : > { %v520_v58 = vmax.f32 %v478_v54, 0.0  ;;  %v470_v59 = vadd.f32 %v1258_v36, %v469_v56 }
 0x104   : > { %v1398_v60 = vpop.f32.mrf.mxu1 }
 0x105   : > { %v518_v61 = vmax.f32 %v470_v59, 0.0  ;;  %v532_v62 = vpack.c.bf16 %v520_v58, %v519_v55  ;;  %v491_v63 = vadd.f32 %v1398_v60, %v1258_v36 }
 0x106   : > { %v482_v0 = vpop.f32.mrf.mxu1 }
 0x107   : > { %v531_v1 = vpack.c.bf16 %v518_v61, %v517_v57  ;;  %v483_v2 = vadd.f32 %v1258_v36, %v482_v0  ;;  %v523_v5 = vmax.f32 %v491_v63, 0.0 }
 0x108   : > { %v1399_v3 = vpop.f32.mrf.mxu1 }
 0x109   : > { %1424 = vmatprep.mubr.bf16.mxu1 %v531_v1  ;;  %v494_v4 = vadd.f32 %v1399_v3, %v1258_v36  ;;  %v521_v7 = vmax.f32 %v483_v2, 0.0 }
 0x10a   : > { %1425 = vmatmul.mubr.bf16.gmra.mxu1 %v532_v62  ;;  %v485_v6 = vpop.f32.mrf.mxu1 }
 0x10b   : > { %v524_v8 = vmax.f32 %v494_v4, 0.0  ;;  %v486_v9 = vadd.f32 %v1258_v36, %v485_v6 }
 0x10c   : > { %v1402_v10 = vpop.f32.mrf.mxu1 }
 0x10d   : > { %v522_v11 = vmax.f32 %v486_v9, 0.0  ;;  %v534_v12 = vpack.c.bf16 %v524_v8, %v523_v5  ;;  %v507_v13 = vadd.f32 %v1402_v10, %v1258_v36 }
 0x10e   : > { %v498_v14 = vpop.f32.mrf.mxu1 }
 0x10f   : > { %v533_v15 = vpack.c.bf16 %v522_v11, %v521_v7  ;;  %v499_v16 = vadd.f32 %v1258_v36, %v498_v14  ;;  %v527_v19 = vmax.f32 %v507_v13, 0.0 }
 0x110   : > { %v1403_v17 = vpop.f32.mrf.mxu1 }
 0x111   : > { %1428 = vmatprep.mubr.bf16.mxu1 %v533_v15  ;;  %v510_v18 = vadd.f32 %v1403_v17, %v1258_v36  ;;  %v525_v21 = vmax.f32 %v499_v16, 0.0 }
 0x112   : > { %1429 = vmatmul.mubr.bf16.gmra.mxu1 %v534_v12  ;;  %v501_v20 = vpop.f32.mrf.mxu1 }
 0x113   : > { %v528_v22 = vmax.f32 %v510_v18, 0.0  ;;  %v502_v23 = vadd.f32 %v1258_v36, %v501_v20  ;;  %v1275_v36 = vld [vmem:[%s2063_s4] ss:$0 sm:$0xff] }
 0x115   : > { %v526_v24 = vmax.f32 %v502_v23, 0.0  ;;  %v536_v25 = vpack.c.bf16 %v528_v22, %v527_v19 }
 0x117   : > { %v535_v26 = vpack.c.bf16 %v526_v24, %v525_v21 }
 0x119   : > { %1432 = vmatprep.mubr.bf16.mxu1 %v535_v26 }
 0x11a   : > { %1433 = vmatmul.mubr.bf16.gmra.mxu1 %v536_v25 }
 0x1c2   : > { %v1422_v34 = vpop.f32.mrf.mxu1 }
 0x1c3   : > { %v651_v48 = vadd.f32 %v1422_v34, %v1275_v36  ;;  %v1937_v34 = vrot.slane %v745_v30, %v753_v31 }
 0x1c4   : > { %v642_v35 = vpop.f32.mrf.mxu1 }
 0x1c5   : > { %v643_v38 = vadd.f32 %v1275_v36, %v642_v35  ;;  %v707_v51 = vmax.f32 %v651_v48, 0.0 }
 0x1c6   : > { %v1423_v37 = vpop.f32.mrf.mxu1 }
 0x1c7   : > { %v705_v42 = vmax.f32 %v643_v38, 0.0  ;;  %v654_v45 = vadd.f32 %v1423_v37, %v1275_v36 }
 0x1c8   : > { %v645_v39 = vpop.f32.mrf.mxu1 }
 0x1c9   : > { %v646_v40 = vadd.f32 %v1275_v36, %v645_v39  ;;  %v708_v49 = vmax.f32 %v654_v45, 0.0 }
 0x1ca   : > { %v1426_v41 = vpop.f32.mrf.mxu1 }
 0x1cb   : > { %v706_v43 = vmax.f32 %v646_v40, 0.0  ;;  %v722_v52 = vpack.c.bf16 %v708_v49, %v707_v51  ;;  %v667_v62 = vadd.f32 %v1426_v41, %v1275_v36 }
 0x1cc   : > { %v658_v44 = vpop.f32.mrf.mxu1 }
 0x1cd   : > { %v721_v46 = vpack.c.bf16 %v706_v43, %v705_v42  ;;  %v659_v55 = vadd.f32 %v1275_v36, %v658_v44  ;;  %v711_v1 = vmax.f32 %v667_v62, 0.0 }
 0x1ce   : > { %v1427_v47 = vpop.f32.mrf.mxu1 }
 0x1cf   : > { %870 = vmatmul.mubr.bf16.vlgmr.msra.gmra.mxu0 %v721_v46  ;;  %v709_v58 = vmax.f32 %v659_v55, 0.0  ;;  %v670_v59 = vadd.f32 %v1427_v47, %v1275_v36 }
 0x1d0   : > { %879 = vmatprep.mubr.bf16.mxu0 %v1716_v33  ;;  %v661_v50 = vpop.f32.mrf.mxu1 }
 0x1d1   : > { %v662_v53 = vadd.f32 %v1275_v36, %v661_v50  ;;  %v712_v63 = vmax.f32 %v670_v59, 0.0 }
 0x1d2   : > { %v1430_v54 = vpop.f32.mrf.mxu1 }
 0x1d3   : > { %v710_v56 = vmax.f32 %v662_v53, 0.0  ;;  %v724_v2 = vpack.c.bf16 %v712_v63, %v711_v1  ;;  %v683_v9 = vadd.f32 %v1430_v54, %v1275_v36 }
 0x1d4   : > { %v674_v57 = vpop.f32.mrf.mxu1 }
 0x1d5   : > { %v723_v60 = vpack.c.bf16 %v710_v56, %v709_v58  ;;  %v675_v3 = vadd.f32 %v1275_v36, %v674_v57  ;;  %v715_v13 = vmax.f32 %v683_v9, 0.0 }
 0x1d6   : > { %v1431_v61 = vpop.f32.mrf.mxu1 }
 0x1d7   : > { %880 = vmatmul.mubr.bf16.gmra.mxu0 %v722_v52  ;;  %v713_v6 = vmax.f32 %v675_v3, 0.0  ;;  %v686_v10 = vadd.f32 %v1431_v61, %v1275_v36 }
 0x1d8   : > { %889 = vmatprep.mubr.bf16.mxu0 %v1716_v33  ;;  %v677_v0 = vpop.f32.mrf.mxu1 }
 0x1d9   : > { %v678_v4 = vadd.f32 %v1275_v36, %v677_v0  ;;  %v716_v14 = vmax.f32 %v686_v10, 0.0 }
 0x1da   : > { %v1434_v5 = vpop.f32.mrf.mxu1 }
 0x1db   : > { %v714_v7 = vmax.f32 %v678_v4, 0.0  ;;  %v726_v16 = vpack.c.bf16 %v716_v14, %v715_v13  ;;  %v699_v21 = vadd.f32 %v1434_v5, %v1275_v36 }
 0x1dc   : > { %v690_v8 = vpop.f32.mrf.mxu1 }
 0x1dd   : > { %v725_v11 = vpack.c.bf16 %v714_v7, %v713_v6  ;;  %v691_v17 = vadd.f32 %v1275_v36, %v690_v8  ;;  %v719_v24 = vmax.f32 %v699_v21, 0.0 }
 0x1de   : > { %v1435_v12 = vpop.f32.mrf.mxu1 }
 0x1df   : > { %890 = vmatmul.mubr.bf16.gmra.mxu0 %v723_v60  ;;  %v717_v19 = vmax.f32 %v691_v17, 0.0  ;;  %v702_v22 = vadd.f32 %v1435_v12, %v1275_v36 }
 0x1e0   : > { %899 = vmatprep.mubr.bf16.mxu0 %v1716_v33  ;;  %v693_v15 = vpop.f32.mrf.mxu1 }
 0x1e1   : > { %v694_v18 = vadd.f32 %v1275_v36, %v693_v15  ;;  %v720_v25 = vmax.f32 %v702_v22, 0.0 }
 0x1e3   : > { %v718_v20 = vmax.f32 %v694_v18, 0.0  ;;  %v728_v26 = vpack.c.bf16 %v720_v25, %v719_v24 }
 0x1e5   : > { %v727_v23 = vpack.c.bf16 %v718_v20, %v717_v19 }
 0x1e7   : > { %900 = vmatmul.mubr.bf16.gmra.mxu0 %v724_v2 }
 0x1e8   : > { %909 = vmatprep.mubr.bf16.mxu0 %v1716_v33 }
 0x1ef   : > { %910 = vmatmul.mubr.bf16.gmra.mxu0 %v725_v11 }
 0x1f0   : > { %919 = vmatprep.mubr.bf16.mxu0 %v1716_v33 }
 0x1f7   : > { %920 = vmatmul.mubr.bf16.gmra.mxu0 %v726_v16 }
 0x1f8   : > { %929 = vmatprep.mubr.bf16.mxu0 %v1716_v33 }
 0x1ff   : > { %930 = vmatmul.mubr.bf16.gmra.mxu0 %v727_v23 }
 0x200   : > { %939 = vmatprep.mubr.bf16.mxu0 %v1716_v33 }
 0x207   : > { %940 = vmatmul.mubr.bf16.gmra.mxu0 %v728_v26 }
 0x28f   : > { %v871_v35 = vpop.f32.mrf.mxu0 }
 0x290   : > { %v872_v36 = vadd.f32 %v871_v35, %v1935_v32 }
 0x291   : > { %v873_v33 = vpop.f32.mrf.mxu0 }
 0x292   : > { %v1300_v37 = vmul.f32 -1.442695, %v872_v36  ;;  %v874_v38 = vadd.f32 %v873_v33, %v1937_v34 }
 0x293   : > { %v875_v39 = vpop.f32.mrf.mxu0 }
 0x294   : > { %1526 = vpow2.f32 %v1300_v37  ;;  %v1301_v40 = vmul.f32 -1.442695, %v874_v38  ;;  %v876_v41 = vadd.f32 %v875_v39, %v1935_v32 }
 0x295   : > { %v877_v42 = vpop.f32.mrf.mxu0 }
 0x296   : > { %1528 = vpow2.f32 %v1301_v40  ;;  %v1302_v43 = vmul.f32 -1.442695, %v876_v41  ;;  %v878_v44 = vadd.f32 %v877_v42, %v1937_v34 }
 0x297   : > { %v881_v45 = vpop.f32.mrf.mxu0 }
 0x298   : > { %1530 = vpow2.f32 %v1302_v43  ;;  %v1303_v46 = vmul.f32 -1.442695, %v878_v44  ;;  %v882_v47 = vadd.f32 %v881_v45, %v1935_v32 }
 0x299   : > { %v883_v48 = vpop.f32.mrf.mxu0 }
 0x29a   : > { %1532 = vpow2.f32 %v1303_v46  ;;  %v1304_v49 = vmul.f32 -1.442695, %v882_v47  ;;  %v884_v50 = vadd.f32 %v883_v48, %v1937_v34 }
 0x29b   : > { %v885_v51 = vpop.f32.mrf.mxu0 }
 0x29c   : > { %1534 = vpow2.f32 %v1304_v49  ;;  %v1305_v52 = vmul.f32 -1.442695, %v884_v50  ;;  %v886_v53 = vadd.f32 %v885_v51, %v1935_v32 }
 0x29d   : > { %v887_v54 = vpop.f32.mrf.mxu0 }
 0x29e   : > { %1536 = vpow2.f32 %v1305_v52  ;;  %v1306_v55 = vmul.f32 -1.442695, %v886_v53  ;;  %v888_v56 = vadd.f32 %v887_v54, %v1937_v34 }
 0x29f   : > { %v891_v57 = vpop.f32.mrf.mxu0 }
 0x2a0   : > { %1538 = vpow2.f32 %v1306_v55  ;;  %v1307_v58 = vmul.f32 -1.442695, %v888_v56  ;;  %v892_v59 = vadd.f32 %v891_v57, %v1935_v32 }
 0x2a1   : > { %v1527_v60 = vpop.eup %1526  ;;  %v893_v61 = vpop.f32.mrf.mxu0 }
 0x2a2   : > { %v1046_v62 = vadd.f32 1.0, %v1527_v60  ;;  %1540 = vpow2.f32 %v1307_v58  ;;  %v1308_v63 = vmul.f32 -1.442695, %v892_v59  ;;  %v894_v0 = vadd.f32 %v893_v61, %v1937_v34 }
 0x2a3   : > { %v1529_v1 = vpop.eup %1528  ;;  %v895_v2 = vpop.f32.mrf.mxu0 }
 0x2a4   : > { %1542 = vrcp.f32 %v1046_v62  ;;  %v1047_v3 = vadd.f32 1.0, %v1529_v1  ;;  %v1309_v4 = vmul.f32 -1.442695, %v894_v0  ;;  %v896_v5 = vadd.f32 %v895_v2, %v1935_v32 }
 0x2a5   : > { %v1531_v6 = vpop.eup %1530  ;;  %1544 = vpow2.f32 %v1308_v63  ;;  %v897_v7 = vpop.f32.mrf.mxu0 }
 0x2a6   : > { %1546 = vrcp.f32 %v1047_v3  ;;  %v1048_v8 = vadd.f32 1.0, %v1531_v6  ;;  %v1310_v9 = vmul.f32 -1.442695, %v896_v5  ;;  %v898_v10 = vadd.f32 %v897_v7, %v1937_v34 }
 0x2a7   : > { %v1533_v11 = vpop.eup %1532  ;;  %1548 = vpow2.f32 %v1309_v4  ;;  %v901_v12 = vpop.f32.mrf.mxu0 }
 0x2a8   : > { %1550 = vrcp.f32 %v1048_v8  ;;  %v1049_v13 = vadd.f32 1.0, %v1533_v11  ;;  %v1311_v14 = vmul.f32 -1.442695, %v898_v10  ;;  %v902_v15 = vadd.f32 %v901_v12, %v1935_v32 }
 0x2a9   : > { %v1535_v16 = vpop.eup %1534  ;;  %1552 = vpow2.f32 %v1310_v9  ;;  %v903_v17 = vpop.f32.mrf.mxu0 }
 0x2aa   : > { %1554 = vrcp.f32 %v1049_v13  ;;  %v1050_v18 = vadd.f32 1.0, %v1535_v16  ;;  %v1312_v19 = vmul.f32 -1.442695, %v902_v15  ;;  %v904_v20 = vadd.f32 %v903_v17, %v1937_v34 }
 0x2ab   : > { %v1537_v21 = vpop.eup %1536  ;;  %1556 = vpow2.f32 %v1311_v14  ;;  %v905_v22 = vpop.f32.mrf.mxu0 }
 0x2ac   : > { %1558 = vrcp.f32 %v1050_v18  ;;  %v1051_v23 = vadd.f32 1.0, %v1537_v21  ;;  %v1313_v24 = vmul.f32 -1.442695, %v904_v20  ;;  %v906_v25 = vadd.f32 %v905_v22, %v1935_v32 }
 0x2ad   : > { %v1539_v26 = vpop.eup %1538  ;;  %1560 = vpow2.f32 %v1312_v19  ;;  %v907_v27 = vpop.f32.mrf.mxu0 }
 0x2ae   : > { %1562 = vrcp.f32 %v1051_v23  ;;  %v1052_v28 = vadd.f32 1.0, %v1539_v26  ;;  %v1314_v29 = vmul.f32 -1.442695, %v906_v25  ;;  %v908_v30 = vadd.f32 %v907_v27, %v1937_v34 }
 0x2af   : > { %v1541_v31 = vpop.eup %1540  ;;  %1564 = vpow2.f32 %v1313_v24  ;;  %v911_v35 = vpop.f32.mrf.mxu0 }
 0x2b0   : > { %1566 = vrcp.f32 %v1052_v28  ;;  %v1053_v36 = vadd.f32 1.0, %v1541_v31  ;;  %v1315_v33 = vmul.f32 -1.442695, %v908_v30  ;;  %v912_v37 = vadd.f32 %v911_v35, %v1935_v32 }
 0x2b1   : > { %v1543_v38 = vpop.eup %1542  ;;  %1568 = vpow2.f32 %v1314_v29  ;;  %v913_v39 = vpop.f32.mrf.mxu0 }
 0x2b2   : > { %v1545_v40 = vpop.eup %1544  ;;  %1142 = vst [vmem:[%s1959_s21] sm:$0xff] %v1543_v38  ;;  %1570 = vrcp.f32 %v1053_v36  ;;  %v1316_v41 = vmul.f32 -1.442695, %v912_v37  ;;  %v914_v42 = vadd.f32 %v913_v39, %v1937_v34 }
 0x2b3   : > { %v1547_v43 = vpop.eup %1546  ;;  %v1054_v44 = vadd.f32 1.0, %v1545_v40  ;;  %1572 = vpow2.f32 %v1315_v33  ;;  %v915_v45 = vpop.f32.mrf.mxu0 }
 0x2b4   : > { %v1549_v46 = vpop.eup %1548  ;;  %1143 = vst [vmem:[%s1959_s21 + $0x8] sm:$0xff] %v1547_v43  ;;  %1574 = vpow2.f32 %v1316_v41  ;;  %v1317_v47 = vmul.f32 -1.442695, %v914_v42  ;;  %v916_v48 = vadd.f32 %v915_v45, %v1935_v32 }
 0x2b5   : > { %v1551_v49 = vpop.eup %1550  ;;  %1576 = vrcp.f32 %v1054_v44  ;;  %v1055_v50 = vadd.f32 1.0, %v1549_v46  ;;  %v917_v51 = vpop.f32.mrf.mxu0 }
 0x2b6   : > { %v1553_v52 = vpop.eup %1552  ;;  %1144 = vst [vmem:[%s1959_s21 + $0x10] sm:$0xff] %v1551_v49  ;;  %1578 = vpow2.f32 %v1317_v47  ;;  %v1318_v53 = vmul.f32 -1.442695, %v916_v48  ;;  %v918_v54 = vadd.f32 %v917_v51, %v1937_v34 }
 0x2b7   : > { %v1555_v55 = vpop.eup %1554  ;;  %1580 = vrcp.f32 %v1055_v50  ;;  %v1056_v56 = vadd.f32 1.0, %v1553_v52  ;;  %v921_v57 = vpop.f32.mrf.mxu0 }
 0x2b8   : > { %v1557_v58 = vpop.eup %1556  ;;  %1145 = vst [vmem:[%s1959_s21 + $0x18] sm:$0xff] %v1555_v55  ;;  %1582 = vpow2.f32 %v1318_v53  ;;  %v1319_v59 = vmul.f32 -1.442695, %v918_v54  ;;  %v922_v60 = vadd.f32 %v921_v57, %v1935_v32 }
 0x2b9   : > { %v1559_v61 = vpop.eup %1558  ;;  %1584 = vrcp.f32 %v1056_v56  ;;  %v1057_v62 = vadd.f32 1.0, %v1557_v58  ;;  %v923_v63 = vpop.f32.mrf.mxu0 }
 0x2ba   : > { %v1561_v0 = vpop.eup %1560  ;;  %1146 = vst [vmem:[%s1959_s21 + $0x20] sm:$0xff] %v1559_v61  ;;  %1586 = vpow2.f32 %v1319_v59  ;;  %v1320_v1 = vmul.f32 -1.442695, %v922_v60  ;;  %v924_v2 = vadd.f32 %v923_v63, %v1937_v34 }
 0x2bb   : > { %v1563_v3 = vpop.eup %1562  ;;  %1588 = vrcp.f32 %v1057_v62  ;;  %v1058_v4 = vadd.f32 1.0, %v1561_v0  ;;  %v925_v5 = vpop.f32.mrf.mxu0 }
 0x2bc   : > { %v1565_v6 = vpop.eup %1564  ;;  %1147 = vst [vmem:[%s1959_s21 + $0x28] sm:$0xff] %v1563_v3  ;;  %1590 = vpow2.f32 %v1320_v1  ;;  %v1321_v7 = vmul.f32 -1.442695, %v924_v2  ;;  %v926_v8 = vadd.f32 %v925_v5, %v1935_v32 }
 0x2bd   : > { %v1567_v9 = vpop.eup %1566  ;;  %1592 = vrcp.f32 %v1058_v4  ;;  %v1059_v10 = vadd.f32 1.0, %v1565_v6  ;;  %v927_v11 = vpop.f32.mrf.mxu0 }
 0x2be   : > { %v1569_v12 = vpop.eup %1568  ;;  %1148 = vst [vmem:[%s1959_s21 + $0x30] sm:$0xff] %v1567_v9  ;;  %1594 = vpow2.f32 %v1321_v7  ;;  %v1322_v13 = vmul.f32 -1.442695, %v926_v8  ;;  %v928_v14 = vadd.f32 %v927_v11, %v1937_v34 }
 0x2bf   : > { %v1571_v15 = vpop.eup %1570  ;;  %1596 = vrcp.f32 %v1059_v10  ;;  %v1060_v16 = vadd.f32 1.0, %v1569_v12  ;;  %v931_v17 = vpop.f32.mrf.mxu0 }
 0x2c0   : > { %v1573_v18 = vpop.eup %1572  ;;  %1149 = vst [vmem:[%s1959_s21 + $0x38] sm:$0xff] %v1571_v15  ;;  %1598 = vpow2.f32 %v1322_v13  ;;  %v1323_v19 = vmul.f32 -1.442695, %v928_v14  ;;  %v932_v20 = vadd.f32 %v931_v17, %v1935_v32 }
 0x2c1   : > { %v1575_v21 = vpop.eup %1574  ;;  %1600 = vrcp.f32 %v1060_v16  ;;  %v1061_v22 = vadd.f32 1.0, %v1573_v18  ;;  %v933_v23 = vpop.f32.mrf.mxu0 }
 0x2c2   : > { %v1577_v24 = vpop.eup %1576  ;;  %v1062_v25 = vadd.f32 1.0, %v1575_v21  ;;  %1602 = vpow2.f32 %v1323_v19  ;;  %v1324_v26 = vmul.f32 -1.442695, %v932_v20  ;;  %v934_v27 = vadd.f32 %v933_v23, %v1937_v34 }
 0x2c3   : > { %v1579_v28 = vpop.eup %1578  ;;  %1150 = vst [vmem:[%s1959_s21 + $0x40] sm:$0xff] %v1577_v24  ;;  %1604 = vrcp.f32 %v1061_v22  ;;  %v935_v29 = vpop.f32.mrf.mxu0 }
 0x2c4   : > { %v1581_v30 = vpop.eup %1580  ;;  %1606 = vrcp.f32 %v1062_v25  ;;  %v1063_v31 = vadd.f32 1.0, %v1579_v28  ;;  %v1325_v35 = vmul.f32 -1.442695, %v934_v27  ;;  %v936_v36 = vadd.f32 %v935_v29, %v1935_v32 }
 0x2c5   : > { %v1583_v33 = vpop.eup %1582  ;;  %1151 = vst [vmem:[%s1959_s21 + $0x48] sm:$0xff] %v1581_v30  ;;  %1608 = vpow2.f32 %v1324_v26  ;;  %v937_v37 = vpop.f32.mrf.mxu0 }
 0x2c6   : > { %v1585_v38 = vpop.eup %1584  ;;  %1610 = vrcp.f32 %v1063_v31  ;;  %v1064_v39 = vadd.f32 1.0, %v1583_v33  ;;  %v1326_v40 = vmul.f32 -1.442695, %v936_v36  ;;  %v938_v41 = vadd.f32 %v937_v37, %v1937_v34 }
 0x2c7   : > { %v1587_v42 = vpop.eup %1586  ;;  %1152 = vst [vmem:[%s1959_s21 + $0x50] sm:$0xff] %v1585_v38  ;;  %1612 = vpow2.f32 %v1325_v35  ;;  %v941_v43 = vpop.f32.mrf.mxu0 }
 0x2c8   : > { %v1589_v44 = vpop.eup %1588  ;;  %1614 = vrcp.f32 %v1064_v39  ;;  %v1065_v45 = vadd.f32 1.0, %v1587_v42  ;;  %v1327_v46 = vmul.f32 -1.442695, %v938_v41  ;;  %v942_v47 = vadd.f32 %v941_v43, %v1935_v32 }
 0x2c9   : > { %v1591_v48 = vpop.eup %1590  ;;  %1153 = vst [vmem:[%s1959_s21 + $0x58] sm:$0xff] %v1589_v44  ;;  %1616 = vpow2.f32 %v1326_v40  ;;  %v943_v49 = vpop.f32.mrf.mxu0 }
 0x2ca   : > { %v1593_v50 = vpop.eup %1592  ;;  %1618 = vrcp.f32 %v1065_v45  ;;  %v1066_v51 = vadd.f32 1.0, %v1591_v48  ;;  %v1328_v52 = vmul.f32 -1.442695, %v942_v47  ;;  %v944_v53 = vadd.f32 %v943_v49, %v1937_v34 }
 0x2cb   : > { %v1595_v54 = vpop.eup %1594  ;;  %1154 = vst [vmem:[%s1959_s21 + $0x60] sm:$0xff] %v1593_v50  ;;  %1620 = vpow2.f32 %v1327_v46  ;;  %v945_v55 = vpop.f32.mrf.mxu0 }
 0x2cc   : > { %v1597_v56 = vpop.eup %1596  ;;  %1622 = vrcp.f32 %v1066_v51  ;;  %v1067_v57 = vadd.f32 1.0, %v1595_v54  ;;  %v1329_v58 = vmul.f32 -1.442695, %v944_v53  ;;  %v946_v59 = vadd.f32 %v945_v55, %v1935_v32 }
 0x2cd   : > { %v1599_v60 = vpop.eup %1598  ;;  %1155 = vst [vmem:[%s1959_s21 + $0x68] sm:$0xff] %v1597_v56  ;;  %1624 = vpow2.f32 %v1328_v52  ;;  %v947_v61 = vpop.f32.mrf.mxu0 }
 0x2ce   : > { %v1601_v62 = vpop.eup %1600  ;;  %1626 = vrcp.f32 %v1067_v57  ;;  %v1068_v63 = vadd.f32 1.0, %v1599_v60  ;;  %v1330_v0 = vmul.f32 -1.442695, %v946_v59  ;;  %v948_v1 = vadd.f32 %v947_v61, %v1937_v34 }
 0x2cf   : > { %v1603_v2 = vpop.eup %1602  ;;  %1156 = vst [vmem:[%s1959_s21 + $0x70] sm:$0xff] %v1601_v62  ;;  %1628 = vpow2.f32 %v1329_v58 }
 0x2d0   : > { %v1605_v3 = vpop.eup %1604  ;;  %1630 = vrcp.f32 %v1068_v63  ;;  %v1069_v4 = vadd.f32 1.0, %v1603_v2  ;;  %v1331_v32 = vmul.f32 -1.442695, %v948_v1 }
 0x2d1   : > { %v1607_v5 = vpop.eup %1606  ;;  %1157 = vst [vmem:[%s1959_s21 + $0x78] sm:$0xff] %v1605_v3  ;;  %1632 = vpow2.f32 %v1330_v0 }
 0x2d2   : > { %v1609_v6 = vpop.eup %1608  ;;  %1158 = vst [vmem:[%s1959_s21 + $0x80] sm:$0xff] %v1607_v5  ;;  %1634 = vrcp.f32 %v1069_v4 }
 0x2d3   : > { %v1611_v7 = vpop.eup %1610  ;;  %v1070_v8 = vadd.f32 1.0, %v1609_v6  ;;  %1636 = vpow2.f32 %v1331_v32 }
 0x2d4   : > { %v1613_v34 = vpop.eup %1612  ;;  %1159 = vst [vmem:[%s1959_s21 + $0x88] sm:$0xff] %v1611_v7 }
 0x2d5   : > { %v1615_v9 = vpop.eup %1614  ;;  %1638 = vrcp.f32 %v1070_v8  ;;  %v1071_v10 = vadd.f32 1.0, %v1613_v34 }
 0x2d6   : > { %v1617_v11 = vpop.eup %1616  ;;  %1160 = vst [vmem:[%s1959_s21 + $0x90] sm:$0xff] %v1615_v9 }
 0x2d7   : > { %v1619_v12 = vpop.eup %1618  ;;  %1640 = vrcp.f32 %v1071_v10  ;;  %v1072_v13 = vadd.f32 1.0, %v1617_v11 }
 0x2d8   : > { %v1621_v14 = vpop.eup %1620  ;;  %1161 = vst [vmem:[%s1959_s21 + $0x98] sm:$0xff] %v1619_v12 }
 0x2d9   : > { %v1623_v15 = vpop.eup %1622  ;;  %1642 = vrcp.f32 %v1072_v13  ;;  %v1073_v16 = vadd.f32 1.0, %v1621_v14 }
 0x2da   : > { %v1625_v17 = vpop.eup %1624  ;;  %1162 = vst [vmem:[%s1959_s21 + $0xa0] sm:$0xff] %v1623_v15 }
 0x2db   : > { %v1627_v18 = vpop.eup %1626  ;;  %1644 = vrcp.f32 %v1073_v16  ;;  %v1074_v19 = vadd.f32 1.0, %v1625_v17 }
 0x2dc   : > { %v1629_v20 = vpop.eup %1628  ;;  %1163 = vst [vmem:[%s1959_s21 + $0xa8] sm:$0xff] %v1627_v18 }
 0x2dd   : > { %v1631_v21 = vpop.eup %1630  ;;  %1646 = vrcp.f32 %v1074_v19  ;;  %v1075_v22 = vadd.f32 1.0, %v1629_v20 }
 0x2de   : > { %v1633_v23 = vpop.eup %1632  ;;  %1164 = vst [vmem:[%s1959_s21 + $0xb0] sm:$0xff] %v1631_v21 }
 0x2df   : > { %v1635_v24 = vpop.eup %1634  ;;  %1648 = vrcp.f32 %v1075_v22  ;;  %v1076_v25 = vadd.f32 1.0, %v1633_v23 }
 0x2e0   : > { %v1637_v26 = vpop.eup %1636  ;;  %1165 = vst [vmem:[%s1959_s21 + $0xb8] sm:$0xff] %v1635_v24 }
 0x2e1   : > { %1650 = vrcp.f32 %v1076_v25  ;;  %v1077_v27 = vadd.f32 1.0, %v1637_v26 }
 0x2e2   : > { %v1639_v28 = vpop.eup %1638 }
 0x2e3   : > { %1166 = vst [vmem:[%s1959_s21 + $0xc0] sm:$0xff] %v1639_v28  ;;  %1652 = vrcp.f32 %v1077_v27 }
 0x2e4   : > { %v1641_v29 = vpop.eup %1640 }
 0x2e5   : > { %1167 = vst [vmem:[%s1959_s21 + $0xc8] sm:$0xff] %v1641_v29 }
 0x2e6   : > { %v1643_v30 = vpop.eup %1642 }
 0x2e7   : > { %1168 = vst [vmem:[%s1959_s21 + $0xd0] sm:$0xff] %v1643_v30 }
 0x2e8   : > { %v1645_v31 = vpop.eup %1644 }
 0x2e9   : > { %1169 = vst [vmem:[%s1959_s21 + $0xd8] sm:$0xff] %v1645_v31 }
 0x2ea   : > { %v1647_v35 = vpop.eup %1646 }
 0x2eb   : > { %1170 = vst [vmem:[%s1959_s21 + $0xe0] sm:$0xff] %v1647_v35 }
 0x2ec   : > { %v1649_v36 = vpop.eup %1648 }
 0x2ed   : > { %1171 = vst [vmem:[%s1959_s21 + $0xe8] sm:$0xff] %v1649_v36 }
 0x2ee   : > { %v1651_v33 = vpop.eup %1650 }
 0x2ef   : > { %1172 = vst [vmem:[%s1959_s21 + $0xf0] sm:$0xff] %v1651_v33 }
 0x2f0   : > { %v1653_v37 = vpop.eup %1652 }
 0x2f1   : > { %1173 = vst [vmem:[%s1959_s21 + $0xf8] sm:$0xff] %v1653_v37 }
 0x2f2   : > { %1667 = shalt.err (!%p1664_p3)
}
 0x2f3   : > { %s1668_s17 = scalar_lea.hbm %s2011_s9, 4096  ;;  %s1672_s20 = scalar_lea.hbm %s2066_s7, 12288 }
 0x2f4   : > { %p1669_p4 = scmp.ne.s32.totalorder %s2011_s9, %s1668_s17  ;;  %p1673_p9 = scmp.lt.s32.totalorder %s2011_s9, %s2066_s7 }
 0x2f5   : > { %p1674_p10 = scmp.lt.s32.totalorder %s1672_s20, %s1668_s17 }
 0x2f6   : > { %p1670_p7 = pnand %p1669_p4, %p1798_p5 }
 0x2f7   : > { %p1675_p11 = por %p1674_p10, %p1673_p9 }
 0x2f8   : > { %p1671_p8 = pneg %p1670_p7 }
 0x2fa   : > { %p1676_p12 = pnand %p1675_p11, %p1671_p8 }
 0x2fc   : > { %1679 = shalt.err (!%p1676_p12)
}
 0x2fd   : > { %s1718_s29 = smov 256   ;;  %s1719_s8 = smov 16  }
 0x2fe   : > { %1436 = dma.vmem_to_hbm [thread:$0]  (%p1798_p5), %s2013_s23, 4096, %s2011_s9, %s2019_s13, %s1718_s29, %s1718_s29, %s1719_s8  }
 0x2ff PF: > { %p1442_p13 = scmp.ge.s32.totalorder %s1714_s27, 2  ;;  %s1204_s28 = sand.u32 1, %s1702_s24  }
 0x300   : > { %s1205_s14 = scalar_lea.sflag [#allocation3], %s1204_s28 }
 0x301   : > { %p1439_p0 = pnand %p1442_p13, %p1802_p6 }
 0x303   : > { %p1440_p1 = pneg %p1439_p0 }
 0x305   : > { %1697 = dma.done.wait (%p1440_p1), %s1205_s14, 4096  }
 0x306   : > { %1699 = vsyncadd (%p1440_p1), %s1205_s14, 4294963200  ;;  %p17_p2 = scmp.ge.s32.totalorder %s1785_s30, 5   ;;  %s2069_s24 = smov %s1706_s25 }
 0x307   : > { %s2070_s25 = smov %s1710_s26  ;;  %s2071_s26 = smov %s1796_s10 }
 0x308   : > { %s2072_s27 = smov %s1785_s30  ;;  %19 = sbr.rel (!%p17_p2) target bundleno = 3 (0x3), region = 83 }
 0x30d   :  { %1210 = vsyncpa [#allocation3], 1 }
 0x30e   :  { %1212 = vsyncpa [#allocation3 + $0x1], 1 }

</bundles_post_ra>
